<compile_context>
chip_gen: v6e
topology: v6e:2x2x1
jax: 0.10.0
libtpu: 0.0.40
codegen_flags: <defaults>
</compile_context>

<pallas_src>
import jax
import jax.numpy as jnp
from jax import lax
from jax.experimental import pallas as pl
from jax.experimental.pallas import tpu as pltpu


def _round_up(x: int, m: int) -> int:
    return ((x + m - 1) // m) * m


def _pick_tile(c: int, n_cols: int, itemsize: int,
               target_bytes: int = 2 << 20, max_bytes: int = 4 << 20) -> int:
    """Rows-per-block (lane axis), 128-aligned, sized so the (C, tile) pred
    block is ~target_bytes (capped at max_bytes) — big enough that the ~0.35us
    per-grid-step overhead is amortized, small enough to double-buffer in the
    scoped-VMEM budget on every generation."""
    per_col = max(c * itemsize, 1)
    tile = max((target_bytes // per_col) // 128 * 128, 128)
    cap = max((max_bytes // per_col) // 128 * 128, 128)
    tile = min(tile, cap)
    return min(tile, _round_up(n_cols, 128))
    # TODO(synk): for very large class counts (C*128*4B per block > a few MiB)
    # a class-axis tiling pass would be needed; typical focal-loss C is small.


def _make_focal_kernel(gamma: float, n_cols: int, tile: int, has_alpha: bool):
    def kernel(*refs):
        if has_alpha:
            pred_ref, labels_ref, alpha_ref, out_ref, acc_ref = refs
        else:
            pred_ref, labels_ref, out_ref, acc_ref = refs
            alpha_ref = None

        ti = pl.program_id(1)                      # tile index along rows

        @pl.when(ti == 0)
        def _():
            acc_ref[...] = jnp.zeros_like(acc_ref)

        pred = pred_ref[...].astype(jnp.float32)   # (C, T) classes on sublanes
        labels = labels_ref[...]                   # (1, T) int32
        c, t = pred.shape

        # log-softmax denominator over classes (sublane-axis reductions)
        col_max = jnp.max(pred, axis=0, keepdims=True)               # (1, T)
        shifted = pred - col_max                                     # (C, T)
        sum_exp = jnp.sum(jnp.exp(shifted), axis=0, keepdims=True)   # (1, T)
        log_sum = jnp.log(sum_exp)                                   # (1, T)

        # gather shifted logit at the target class via one-hot masked reduce
        class_ids = lax.broadcasted_iota(jnp.int32, (c, t), 0)       # (C, T)
        one_hot = class_ids == labels                                # (C, T)
        s_label = jnp.sum(jnp.where(one_hot, shifted, 0.0),
                          axis=0, keepdims=True)                     # (1, T)

        logpt = s_label - log_sum                                    # (1, T)
        pt = jnp.exp(logpt)                                          # (1, T)

        if has_alpha:
            alpha_v = alpha_ref[...].astype(jnp.float32)             # (C, 1)
            at = jnp.sum(jnp.where(one_hot, alpha_v, 0.0),
                         axis=0, keepdims=True)                      # (1, T)
            logpt = logpt * at

        # focal factor (1 - pt) ** gamma; clamp at 0 (see header note)
        one_m_pt = jnp.maximum(1.0 - pt, 0.0)
        if gamma == 0.0:
            focal = jnp.ones_like(pt)
        elif gamma == 0.5:
            focal = jnp.sqrt(one_m_pt)
        elif gamma == 1.0:
            focal = one_m_pt
        elif gamma == 2.0:
            focal = one_m_pt * one_m_pt
        else:
            focal = jnp.where(one_m_pt > 0.0,
                              jnp.exp(gamma * jnp.log(one_m_pt)), 0.0)

        loss_row = -focal * logpt                                    # (1, T)

        # ragged-last-tile mask: garbage columns past n_cols (no HBM padding
        # was done) may carry labels >= 0, so mask strictly on column index.
        col = ti * tile + lax.broadcasted_iota(jnp.int32, (1, t), 1)
        acc_ref[...] += jnp.where(col < n_cols, loss_row, 0.0)

        @pl.when(ti == pl.num_programs(1) - 1)
        def _():
            partial = jnp.sum(acc_ref[...])
            out_ref[...] = jnp.full(out_ref.shape, partial, jnp.float32)

    return kernel


def focal_loss_pallas(logits, target, gamma=0.5, alpha=None,
                      size_average=True, tile_n=None):
    """logits: (N, C) or (B, C, *spatial); target: matching int class indices."""
    logits = jnp.asarray(logits)
    target = jnp.asarray(target)

    if logits.ndim > 2:
        b, c = int(logits.shape[0]), int(logits.shape[1])
        pred = logits.reshape(b, c, -1)        # contiguous reshape, no HBM copy
    else:
        c = int(logits.shape[1])
        b = 1
        pred = logits.T[None]                  # small 2-D case: single transpose
    n_cols = int(pred.shape[2])
    labels = target.reshape(b, 1, n_cols).astype(jnp.int32)
    n_total = b * n_cols

    itemsize = jnp.dtype(pred.dtype).itemsize
    if tile_n is None:
        tile = _pick_tile(c, n_cols, itemsize)
    else:
        tile = min(_round_up(max(int(tile_n), 128), 128), _round_up(n_cols, 128))
    grid = (b, pl.cdiv(n_cols, tile))

    has_alpha = alpha is not None
    in_specs = [
        pl.BlockSpec((pl.Squeezed(), c, tile), lambda bi, ti: (bi, 0, ti)),
        pl.BlockSpec((pl.Squeezed(), 1, tile), lambda bi, ti: (bi, 0, ti)),
    ]
    args = [pred, labels]
    if has_alpha:
        if isinstance(alpha, (float, int)):
            alpha_vec = jnp.array([float(alpha), 1.0 - float(alpha)], jnp.float32)
        else:
            alpha_vec = jnp.asarray(alpha, jnp.float32).reshape(-1)
        assert alpha_vec.shape[0] == c, (
            f"alpha has {alpha_vec.shape[0]} weights but there are {c} classes; "
            "a scalar alpha implies binary classification (C == 2)")
        in_specs.append(pl.BlockSpec((c, 1), lambda bi, ti: (0, 0)))
        args.append(alpha_vec.reshape(c, 1))

    partials = pl.pallas_call(
        _make_focal_kernel(float(gamma), n_cols, tile, has_alpha),
        out_shape=jax.ShapeDtypeStruct((b, 1, 128), jnp.float32),
        grid=grid,
        in_specs=in_specs,
        out_specs=pl.BlockSpec((1, 1, 128), lambda bi, ti: (bi, 0, 0)),
        scratch_shapes=[pltpu.VMEM((1, tile), jnp.float32)],
        compiler_params=pltpu.CompilerParams(
            dimension_semantics=("parallel", "arbitrary"),
            vmem_limit_bytes=32 * 1024 * 1024),
    )(*args)

    total = jnp.sum(partials[:, 0, 0])
    if size_average:
        return total / jnp.float32(n_total)
    return total


def focal_loss_ref(logits, target, gamma=0.5, alpha=None, size_average=True):
    """Pure-JAX reference mirroring the PyTorch FocalLoss forward."""
    x = jnp.asarray(logits, jnp.float32)
    if x.ndim > 2:
        b, c = x.shape[0], x.shape[1]
        x = x.reshape(b, c, -1)
        x = jnp.transpose(x, (0, 2, 1)).reshape(-1, c)
    t = jnp.asarray(target).reshape(-1)
    logpt = jax.nn.log_softmax(x, axis=1)
    logpt = jnp.take_along_axis(logpt, t[:, None], axis=1)[:, 0]
    pt = jnp.exp(logpt)
    if alpha is not None:
        if isinstance(alpha, (float, int)):
            alpha_vec = jnp.array([float(alpha), 1.0 - float(alpha)], jnp.float32)
        else:
            alpha_vec = jnp.asarray(alpha, jnp.float32).reshape(-1)
        logpt = logpt * alpha_vec[t]
    loss = -((1.0 - pt) ** gamma) * logpt
    return jnp.mean(loss) if size_average else jnp.sum(loss)


if __name__ == "__main__":
    key = jax.random.PRNGKey(0)
    k1, k2, k3, k4 = jax.random.split(key, 4)

    # 4-D segmentation-style input: (B, C, H, W) logits, (B, H, W) targets.
    # No transpose / no padding in the wrapper; grid = (B, HW/tile).
    B, C, H, W = 2, 4, 16, 16
    logits = jax.random.normal(k1, (B, C, H, W), dtype=jnp.float32)
    target = jax.random.randint(k2, (B, H, W), 0, C, dtype=jnp.int32)

    loss = jax.block_until_ready(focal_loss_pallas(logits, target, gamma=0.5))
    ref = jax.block_until_ready(focal_loss_ref(logits, target, gamma=0.5))
    assert jnp.allclose(loss, ref, rtol=1e-5, atol=1e-5), (loss, ref)

    # 2-D input with per-class alpha, sum reduction, N not a multiple of 128
    # (exercises the ragged-last-tile column mask; no HBM padding is done).
    N2, C2 = 10, 7
    logits2 = jax.random.normal(k3, (N2, C2), dtype=jnp.float32)
    target2 = jax.random.randint(k4, (N2,), 0, C2, dtype=jnp.int32)
    alpha = [0.05, 0.1, 0.15, 0.2, 0.2, 0.15, 0.15]
    loss2 = jax.block_until_ready(
        focal_loss_pallas(logits2, target2, gamma=2.0, alpha=alpha,
                          size_average=False))
    ref2 = jax.block_until_ready(
        focal_loss_ref(logits2, target2, gamma=2.0, alpha=alpha,
                       size_average=False))
    assert jnp.allclose(loss2, ref2, rtol=1e-5, atol=1e-5), (loss2, ref2)

    print("KERNEL_OK")
</pallas_src>

<mosaic_0001>
module attributes {stable_mosaic.version = 11 : i64} {
  func.func @kernel(%arg0: i32, %arg1: i32, %arg2: memref<1x4x256xf32, #tpu.memory_space<vmem>>, %arg3: memref<1x1x256xi32, #tpu.memory_space<vmem>>, %arg4: memref<1x1x128xf32, #tpu.memory_space<vmem>>, %arg5: memref<1x256xf32, #tpu.memory_space<vmem>>) attributes {dimension_semantics = [#tpu.dimension_semantics<parallel>, #tpu.dimension_semantics<arbitrary>], iteration_bounds = array<i64: 2, 1>, scalar_prefetch = 0 : i64, scratch_operands = 1 : i64, tpu.core_type = #tpu.core_type<tc>, window_params = [{transform_indices = @transform_0, window_bounds = array<i64: 1, 4, 256>}, {transform_indices = @transform_1, window_bounds = array<i64: 1, 1, 256>}, {transform_indices = @transform_2, window_bounds = array<i64: 1, 1, 128>}]} {
    %c0_i32 = arith.constant 0 : i32
    %0 = arith.cmpi eq, %arg1, %c0_i32 : i32
    %1 = arith.extui %0 : i1 to i32
    %c0_i32_0 = arith.constant 0 : i32
    %2 = arith.cmpi ne, %1, %c0_i32_0 : i32
    scf.if %2 {
      %cst_20 = arith.constant 0.000000e+00 : f32
      %46 = vector.broadcast %cst_20 : f32 to vector<1x256xf32>
      %c0_21 = arith.constant 0 : index
      %c0_22 = arith.constant 0 : index
      %47 = vector.load %arg5[%c0_21, %c0_22] : memref<1x256xf32, #tpu.memory_space<vmem>>, vector<1x256xf32>
      tpu.vector_store %arg5[%c0_21, %c0_22], %46 {strides = array<i32>} : memref<1x256xf32, #tpu.memory_space<vmem>>, vector<1x256xf32>,
    } else {
    }
    %c0 = arith.constant 0 : index
    %c0_1 = arith.constant 0 : index
    %c0_2 = arith.constant 0 : index
    %3 = vector.load %arg2[%c0, %c0_1, %c0_2] : memref<1x4x256xf32, #tpu.memory_space<vmem>>, vector<1x4x256xf32>
    %4 = vector.shape_cast %3 : vector<1x4x256xf32> to vector<4x256xf32>
    %c0_3 = arith.constant 0 : index
    %c0_4 = arith.constant 0 : index
    %c0_5 = arith.constant 0 : index
    %5 = vector.load %arg3[%c0_3, %c0_4, %c0_5] : memref<1x1x256xi32, #tpu.memory_space<vmem>>, vector<1x1x256xi32>
    %6 = vector.shape_cast %5 : vector<1x1x256xi32> to vector<1x256xi32>
    %cst = arith.constant dense<0xFF800000> : vector<256xf32>
    %7 = vector.multi_reduction <maximumf>, %4, %cst [0] : vector<4x256xf32> to vector<256xf32>
    %8 = vector.shape_cast %7 : vector<256xf32> to vector<1x256xf32>
    %9 = vector.broadcast %8 : vector<1x256xf32> to vector<4x256xf32>
    %10 = arith.subf %4, %9 : vector<4x256xf32>
    %11 = math.exp %10 : vector<4x256xf32>
    %cst_6 = arith.constant dense<0.000000e+00> : vector<256xf32>
    %12 = vector.multi_reduction <add>, %11, %cst_6 [0] : vector<4x256xf32> to vector<256xf32>
    %13 = vector.shape_cast %12 : vector<256xf32> to vector<1x256xf32>
    %14 = math.log %13 : vector<1x256xf32>
    %15 = tpu.iota {dimensions = array<i32: 0>} : vector<4x256xi32>
    %16 = vector.broadcast %6 : vector<1x256xi32> to vector<4x256xi32>
    %17 = arith.cmpi eq, %15, %16 : vector<4x256xi32>
    %cst_7 = arith.constant 0.000000e+00 : f32
    %18 = vector.broadcast %cst_7 : f32 to vector<4x256xf32>
    %19 = arith.select %17, %10, %18 : vector<4x256xi1>, vector<4x256xf32>
    %cst_8 = arith.constant dense<0.000000e+00> : vector<256xf32>
    %20 = vector.multi_reduction <add>, %19, %cst_8 [0] : vector<4x256xf32> to vector<256xf32>
    %21 = vector.shape_cast %20 : vector<256xf32> to vector<1x256xf32>
    %22 = arith.subf %21, %14 : vector<1x256xf32>
    %23 = math.exp %22 : vector<1x256xf32>
    %cst_9 = arith.constant 1.000000e+00 : f32
    %24 = vector.broadcast %cst_9 : f32 to vector<1x256xf32>
    %25 = arith.subf %24, %23 : vector<1x256xf32>
    %cst_10 = arith.constant 0.000000e+00 : f32
    %26 = vector.broadcast %cst_10 : f32 to vector<1x256xf32>
    %27 = arith.maximumf %25, %26 : vector<1x256xf32>
    %28 = math.sqrt %27 : vector<1x256xf32>
    %cst_11 = arith.constant 0.000000e+00 : f32
    %29 = vector.broadcast %cst_11 : f32 to vector<1x256xf32>
    %30 = arith.subf %29, %28 : vector<1x256xf32>
    %31 = arith.mulf %30, %22 : vector<1x256xf32>
    %c256_i32 = arith.constant 256 : i32
    %32 = arith.muli %arg1, %c256_i32 : i32
    %33 = tpu.iota {dimensions = array<i32: 1>} : vector<1x256xi32>
    %34 = vector.broadcast %32 : i32 to vector<1x256xi32>
    %35 = arith.addi %34, %33 : vector<1x256xi32>
    %c0_12 = arith.constant 0 : index
    %c0_13 = arith.constant 0 : index
    %36 = vector.load %arg5[%c0_12, %c0_13] : memref<1x256xf32, #tpu.memory_space<vmem>>, vector<1x256xf32>
    %c256_i32_14 = arith.constant 256 : i32
    %37 = vector.broadcast %c256_i32_14 : i32 to vector<1x256xi32>
    %38 = arith.cmpi slt, %35, %37 : vector<1x256xi32>
    %cst_15 = arith.constant 0.000000e+00 : f32
    %39 = vector.broadcast %cst_15 : f32 to vector<1x256xf32>
    %40 = arith.select %38, %31, %39 : vector<1x256xi1>, vector<1x256xf32>
    %41 = arith.addf %36, %40 : vector<1x256xf32>
    %c0_16 = arith.constant 0 : index
    %c0_17 = arith.constant 0 : index
    %42 = vector.load %arg5[%c0_16, %c0_17] : memref<1x256xf32, #tpu.memory_space<vmem>>, vector<1x256xf32>
    tpu.vector_store %arg5[%c0_16, %c0_17], %41 {strides = array<i32>} : memref<1x256xf32, #tpu.memory_space<vmem>>, vector<1x256xf32>,
    %c0_i32_18 = arith.constant 0 : i32
    %43 = arith.cmpi eq, %arg1, %c0_i32_18 : i32
    %44 = arith.extui %43 : i1 to i32
    %c0_i32_19 = arith.constant 0 : i32
    %45 = arith.cmpi ne, %44, %c0_i32_19 : i32
    scf.if %45 {
      %c0_20 = arith.constant 0 : index
      %c0_21 = arith.constant 0 : index
      %46 = vector.load %arg5[%c0_20, %c0_21] : memref<1x256xf32, #tpu.memory_space<vmem>>, vector<1x256xf32>
      %47 = vector.shape_cast %46 : vector<1x256xf32> to vector<1x1x256xf32>
      %cst_22 = arith.constant dense<0.000000e+00> : vector<1xf32>
      %48 = vector.multi_reduction <add>, %47, %cst_22 [1, 2] : vector<1x1x256xf32> to vector<1xf32>
      %49 = vector.shape_cast %48 : vector<1xf32> to vector<1x1x1xf32>
      %50 = vector.extract %49[0, 0, 0] : f32 from vector<1x1x1xf32>
      %51 = vector.broadcast %50 : f32 to vector<1x1x128xf32>
      %c0_23 = arith.constant 0 : index
      %c0_24 = arith.constant 0 : index
      %c0_25 = arith.constant 0 : index
      %52 = vector.load %arg4[%c0_23, %c0_24, %c0_25] : memref<1x1x128xf32, #tpu.memory_space<vmem>>, vector<1x1x128xf32>
      tpu.vector_store %arg4[%c0_23, %c0_24, %c0_25], %51 {strides = array<i32>} : memref<1x1x128xf32, #tpu.memory_space<vmem>>, vector<1x1x128xf32>,
    } else {
    }
    return
  }
  func.func @transform_0(%arg0: i32, %arg1: i32) -> (i32, i32, i32) {
    %c0_i32 = arith.constant 0 : i32
    %c0_i32_0 = arith.constant 0 : i32
    return %arg0, %c0_i32, %arg1 : i32, i32, i32
  }
  func.func @transform_1(%arg0: i32, %arg1: i32) -> (i32, i32, i32) {
    %c0_i32 = arith.constant 0 : i32
    %c0_i32_0 = arith.constant 0 : i32
    return %arg0, %c0_i32, %arg1 : i32, i32, i32
  }
  func.func @transform_2(%arg0: i32, %arg1: i32) -> (i32, i32, i32) {
    %c0_i32 = arith.constant 0 : i32
    %c0_i32_0 = arith.constant 0 : i32
    %c0_i32_1 = arith.constant 0 : i32
    return %arg0, %c0_i32, %c0_i32_0 : i32, i32, i32
  }
}

</mosaic_0001>

<bundles_post_ra>
// kernel: tpu_custom_call.1
= control target key start
LH: loop header
LB: loop body
LE: loop exit
PB: predicated region body
PF: predicated region fallthrough
CT: control target
= control target key end

     0   :  { %7 = vsyncpa [#allocation4], 0  ;;  %s983_s0 = inlined_call_operand.hbm [shape: f32[2,4,256], index: 0, kind: input, shape index: {}]   ;;  %s984_s1 = inlined_call_operand.hbm [shape: s32[2,1,256], index: 1, kind: input, shape index: {}]   ;;  %s985_s2 = inlined_call_operand.hbm [shape: f32[2,1,128], index: 2, kind: output, shape index: {}]  }
   0x1   :  { %9 = vsyncpa [#allocation4 + $0x1], 0 }
   0x2   :  { %10 = vsyncpa [#allocation7], 0 }
   0x3   :  { %12 = vsyncpa [#allocation7 + $0x1], 0 }
   0x4   :  { %13 = vsyncpa [#allocation5], 0 }
   0x5   :  { %15 = vsyncpa [#allocation5 + $0x1], 0  ;;  %s783_s9 = smov 0   ;;  %s785_s10 = smov 0  }
   0x6   :  { %s787_s11 = smov 0   ;;  %s789_s12 = smov 0  }
   0x7   :  { %s791_s13 = smov 0   ;;  %s793_s14 = smov 0  }
   0x8 LB: > { %s517_s15 = sadd.s32 4294967295, %s761_s14   ;;  %s518_s16 = sadd.s32 4294967294, %s761_s14   ;;  %s761_s14 = sphi %s793_s14, %s21_s14   ;;  %s757_s13 = sphi %s791_s13, %s999_s13   ;;  %s753_s12 = sphi %s789_s12, %s998_s12   ;;  %s749_s11 = sphi %s787_s11, %s997_s11   ;;  %s745_s10 = sphi %s785_s10, %s996_s10   ;;  %s741_s9 = sphi %s783_s9, %s995_s9  }
   0x9   : > { %s33_s17 = sadd.s32 1, %s757_s13  ;;  %s42_s18 = sadd.s32 1, %s749_s11 }
   0xa   : > { %p35_p0 = scmp.ge.s32.totalorder %s33_s17, 2  ;;  %p49_p1 = scmp.ne.s32.totalorder %s749_s11, %s745_s10 }
   0xb   : > { %p50_p2 = scmp.eq.s32.totalorder %s761_s14, 0  ;;  %p55_p3 = scmp.ne.s32.totalorder %s745_s10, %s741_s9 }
   0xc   : > { %s1001_s17 = smov (%p35_p0, %s33_s17), 0  ;;  %p56_p5 = scmp.eq.s32.totalorder %s517_s15, 0 }
   0xd   : > { %p824_p4 = por %p50_p2, %p49_p1  ;;  %s37_s20 = ssub.s32 %s757_s13, %s1001_s17 }
   0xe   : > { %p107_p6 = scmp.eq.s32.totalorder %s517_s15, 1  ;;  %p40_p7 = scmp.eq.s32.totalorder %s37_s20, 0 }
   0xf   : > { %p830_p8 = por %p56_p5, %p55_p3  ;;  %p113_p10 = scmp.eq.s32.totalorder %s518_s16, 1 }
  0x10   : > { %p834_p9 = por %p107_p6, %p49_p1  ;;  %p554_p13 = scmp.lt.s32.totalorder %s761_s14, 2 }
  0x11   : > { %s839_s23 = scalar_select %p40_p7, %s749_s11, %s42_s18  }
  0x12   : > { %p841_p11 = por %p113_p10, %p55_p3  ;;  %s848_s25 = sand.u32 1, %s749_s11  }
  0x13   : > { %s521_s26 = sshll.u32 %s848_s25, 3  ;;  %s533_s27 = sshll.u32 %s757_s13, 7 }
  0x14   : > { %s145_s30 = scalar_lea.hbm %s983_s0, %s533_s27  ;;  %s137_s3 = scalar_lea.vmem [#allocation3], %s521_s26 }
  0x15   : > { %s147_s4 = sshll.u32 %s137_s3, 4  ;;  %p857_p0 = pnand %p554_p13, %p824_p4  ;;  %s148_s4 = int_to_ptr.vmem [resolvable:$true] %s147_s4 }
  0x16   : > { %p527_p1 = scmp.ge.s32.totalorder %s761_s14, 1  ;;  %p173_p2 = scmp.lt.s32.totalorder %s761_s14, 3 }
  0x17   : > { %s134_s6 = scalar_lea.sflag [#allocation4], %s848_s25  ;;  %p623_p3 = pneg %p857_p0 }
  0x18   : > { %s634_s7 = scalar_lea.vmem %s148_s4, 128  ;;  %s763_s8 = smov [#allocation3]  }
  0x19   : > { %p635_p5 = scmp.ne.s32.totalorder %s148_s4, %s634_s7  ;;  %s639_s15 = sshll.u32 %s763_s8, 4  ;;  %s640_s15 = int_to_ptr.vmem [resolvable:$false] %s639_s15 }
  0x1a   : > { %s641_s16 = scalar_lea.vmem %s640_s15, 256  ;;  %p642_p4 = scmp.lt.s32.totalorder %s148_s4, %s640_s15 }
  0x1b   : > { %p637_p6 = pnand %p635_p5, %p623_p3  ;;  %p643_p10 = scmp.lt.s32.totalorder %s641_s16, %s634_s7 }
  0x1d   : > { %p638_p7 = pneg %p637_p6  ;;  %p644_p13 = por %p643_p10, %p642_p4 }
  0x1f   : > { %p645_p12 = pnand %p644_p13, %p638_p7 }
  0x21   : > { %648 = shalt.err (!%p645_p12)
}
  0x22   : > { %546 = dma.hbm_to_vmem [thread:$0]  (!%p857_p0), %s145_s30, 128, %s148_s4, %s134_s6  }
  0x23   : > { %p875_p5 = pnand %p527_p1, %p173_p2  ;;  %s524_s19 = sshll.u32 %s848_s25, 1 }
  0x24   : > { %s534_s20 = sshll.u32 %s757_s13, 5  ;;  %s158_s29 = scalar_lea.vmem [#allocation6], %s524_s19 }
  0x25   : > { %s166_s28 = scalar_lea.hbm %s984_s1, %s534_s20  ;;  %s168_s3 = sshll.u32 %s158_s29, 4  ;;  %s169_s3 = int_to_ptr.vmem [resolvable:$true] %s168_s3 }
  0x26   : > { %s155_s7 = scalar_lea.sflag [#allocation7], %s848_s25  ;;  %s662_s8 = scalar_lea.vmem %s169_s3, 32 }
  0x27   : > { %p663_p12 = scmp.ne.s32.totalorder %s169_s3, %s662_s8  ;;  %s764_s30 = smov [#allocation6]  }
  0x28   : > { %s667_s4 = sshll.u32 %s764_s30, 4  ;;  %s668_s4 = int_to_ptr.vmem [resolvable:$false] %s667_s4 }
  0x29   : > { %p665_p6 = pnand %p663_p12, %p623_p3  ;;  %s669_s6 = scalar_lea.vmem %s668_s4, 64 }
  0x2a   : > { %p670_p1 = scmp.lt.s32.totalorder %s169_s3, %s668_s4  ;;  %p671_p2 = scmp.lt.s32.totalorder %s669_s6, %s662_s8 }
  0x2b   : > { %p666_p7 = pneg %p665_p6 }
  0x2c   : > { %p672_p4 = por %p671_p2, %p670_p1 }
  0x2e   : > { %p673_p10 = pnand %p672_p4, %p666_p7 }
  0x30   : > { %676 = shalt.err (!%p673_p10)
}
  0x31   : > { %549 = dma.hbm_to_vmem [thread:$0]  (!%p857_p0), %s166_s28, 32, %s169_s3, %s155_s7  }
  0x32   : > { %177 = sbr.rel (%p875_p5) target bundleno = 405 (0x195), region = 28  ;;  %s893_s25 = sand.u32 (!%p875_p5), 1, %s745_s10  }
  0x33   : > { %s528_s15 = sshll.u32 (!%p875_p5), %s893_s25, 3  ;;  %s180_s16 = scalar_lea.sflag (!%p875_p5), [#allocation4], %s893_s25 }
  0x34   : > { %s183_s19 = scalar_lea.vmem (!%p875_p5), [#allocation3], %s528_s15 }
  0x37   : > { %728 = dma.done.wait (%p830_p8), %s180_s16, 128  }
  0x38   : > { %730 = vsyncadd (%p830_p8), %s180_s16, 4294967168  ;;  %s529_s5 = sshll.u32 %s893_s25, 1  ;;  %s189_s18 = scalar_lea.sflag [#allocation7], %s893_s25 }
  0x39   : > { %s192_s20 = scalar_lea.vmem [#allocation6], %s529_s5 }
  0x3a   : > { %732 = dma.done.wait (%p830_p8), %s189_s18, 32  }
  0x3b   : > { %734 = vsyncadd (%p830_p8), %s189_s18, 4294967264  ;;  %v223_v0 = vlaneseq  ;;  %v765_v2 = vmov 0.0   ;;  %vm233_vm1 = vcmask 1043456   ;;  %v228_v3 = vld [vmem:[%s183_s19] sm:$0xff]  ;;  %v229_v24 = vld [vmem:[%s192_s20] sm:$0x3] }
  0x3c   : > { %v231_v4 = vcombine.high %v228_v3, %v228_v3  ;;  %v234_v5 = vsel %vm233_vm1, %v228_v3, -inf  ;;  %vm386_vm8 = vcmask 1040384   ;;  %s216_s21 = scalar_lea.vmem [#allocation8], %s893_s25  ;;  %s530_s27 = sshll.u32 %s753_s12, 4 }
  0x3d   : > { %vm907_vm0 = vcmp.lt.s32.totalorder %v223_v0, 256  ;;  %v235_v6 = vrot.slane %v234_v5, 4  ;;  %v915_v22 = vshrl.u32 %v223_v0, 7  ;;  %s414_s26 = sshll.u32 %s216_s21, 4  ;;  %s412_s7 = scalar_lea.hbm %s985_s2, %s530_s27  ;;  %s938_s26 = int_to_ptr.vmem [resolvable:$true] %s414_s26 }
  0x3e   : > { %227 = vst.msk [vmem:[#allocation2] sm:$0x3] %vm907_vm0, %v765_v2  ;;  %v241_v7 = vsel %vm233_vm1, %v231_v4, -inf  ;;  %s402_s8 = scalar_lea.sflag [#allocation5], %s893_s25  ;;  %s677_s30 = scalar_lea.vmem %s938_s26, 16 }
  0x3f   : > { %v236_v8 = vmax.f32 %v234_v5, %v235_v6  ;;  %v242_v9 = vrot.slane %v241_v7, 4  ;;  %v280_v23 = vsub.s32 0, %v915_v22  ;;  %v284_v25 = vsub.s32 1, %v915_v22  ;;  %p678_p8 = scmp.ne.s32.totalorder %s938_s26, %s677_s30  ;;  %s767_s4 = smov [#allocation8]  }
  0x40   : > { %s681_s12 = sshll.u32 %s767_s4, 4  ;;  %s682_s12 = int_to_ptr.vmem [resolvable:$false] %s681_s12 }
  0x41   : > { %v237_v10 = vrot.slane %v236_v8, 2  ;;  %v243_v11 = vmax.f32 %v241_v7, %v242_v9  ;;  %v281_v26 = vrot.slane %v229_v24, %v280_v23  ;;  %v285_v27 = vrot.slane %v229_v24, %v284_v25  ;;  %p679_p0 = pnand %p678_p8, %p834_p9  ;;  %s683_s6 = scalar_lea.vmem %s682_s12, 32 }
  0x42   : > { %p684_p13 = scmp.lt.s32.totalorder %s938_s26, %s682_s12  ;;  %p685_p5 = scmp.lt.s32.totalorder %s683_s6, %s677_s30 }
  0x43   : > { %v238_v12 = vmax.f32 %v236_v8, %v237_v10  ;;  %v244_v13 = vrot.slane %v243_v11, 2  ;;  %vm286_vm2 = vcmp.eq.s32.totalorder %v915_v22, %v281_v26  ;;  %vm287_vm3 = vcmp.eq.s32.totalorder %v915_v22, %v285_v27  ;;  %p680_p3 = pneg %p679_p0 }
  0x44   : > { %p686_p12 = por %p685_p5, %p684_p13 }
  0x45   : > { %v239_v14 = vrot.slane %v238_v12, 1  ;;  %v245_v15 = vmax.f32 %v243_v11, %v244_v13 }
  0x46   : > { %p687_p6 = pnand %p686_p12, %p680_p3 }
  0x47   : > { %v240_v16 = vmax.f32 %v238_v12, %v239_v14  ;;  %v246_v17 = vrot.slane %v245_v15, 1 }
  0x49   : > { %v247_v18 = vmax.f32 %v245_v15, %v246_v17  ;;  %v766_v15 = vmov 1966171168  }
  0x4b   : > { %v250_v19 = vcombine.low %v240_v16, %v247_v18  ;;  %v351_v16 = vunpack.c.l.s4 %v766_v15 }
  0x4d   : > { %v252_v20 = vsub.f32 %v228_v3, %v250_v19  ;;  %v352_v27 = vunpack.c.0.s8 %v351_v16 }
  0x4f   : > { %v253_v21 = vmul.f32 1.442695, %v252_v20  ;;  %v289_v28 = vcombine.high %v252_v20, %v252_v20  ;;  %v291_v30 = vsel %vm286_vm2, %v252_v20, 0.0 }
  0x50   : > { %v293_v36 = vsel %vm233_vm1, %v291_v30, 0.0 }
  0x51   : > { %607 = vpow2.f32 %v253_v21  ;;  %v292_v34 = vsel %vm287_vm3, %v289_v28, 0.0  ;;  %v294_v42 = vrot.slane %v293_v36, 4 }
  0x52   : > { %v300_v39 = vsel %vm233_vm1, %v292_v34, 0.0 }
  0x53   : > { %v301_v45 = vrot.slane %v300_v39, 4  ;;  %v295_v48 = vadd.f32 %v294_v42, %v293_v36 }
  0x55   : > { %v302_v51 = vadd.f32 %v301_v45, %v300_v39  ;;  %v296_v53 = vrot.slane %v295_v48, 2 }
  0x57   : > { %v303_v54 = vrot.slane %v302_v51, 2  ;;  %v297_v55 = vadd.f32 %v296_v53, %v295_v48 }
  0x59   : > { %v304_v56 = vadd.f32 %v303_v54, %v302_v51  ;;  %v298_v57 = vrot.slane %v297_v55, 1 }
  0x5b   : > { %v305_v58 = vrot.slane %v304_v56, 1  ;;  %v299_v59 = vadd.f32 %v298_v57, %v297_v55 }
  0x5d   : > { %v306_v62 = vadd.f32 %v305_v58, %v304_v56 }
  0x5e   : > { %v608_v29 = vpop.eup %607 }
  0x5f   : > { %v256_v31 = vcombine.high %v608_v29, %v608_v29  ;;  %v258_v32 = vsel %vm233_vm1, %v608_v29, 0.0 }
  0x60   : > { %v259_v33 = vrot.slane %v258_v32, 4 }
  0x61   : > { %v265_v35 = vsel %vm233_vm1, %v256_v31, 0.0 }
  0x62   : > { %v260_v37 = vadd.f32 %v259_v33, %v258_v32  ;;  %v266_v38 = vrot.slane %v265_v35, 4  ;;  %v355_v32 = vsub.s32 %v352_v27, %v915_v22 }
  0x64   : > { %v261_v40 = vrot.slane %v260_v37, 2  ;;  %v267_v41 = vadd.f32 %v266_v38, %v265_v35  ;;  %v342_v35 = vld [vmem:[#allocation2] sm:$0x3] }
  0x66   : > { %v262_v43 = vadd.f32 %v261_v40, %v260_v37  ;;  %v268_v44 = vrot.slane %v267_v41, 2 }
  0x68   : > { %v263_v46 = vrot.slane %v262_v43, 1  ;;  %v269_v47 = vadd.f32 %v268_v44, %v267_v41 }
  0x6a   : > { %v264_v49 = vadd.f32 %v263_v46, %v262_v43  ;;  %v270_v50 = vrot.slane %v269_v47, 1 }
  0x6c   : > { %v271_v52 = vadd.f32 %v270_v50, %v269_v47  ;;  %609 = vlog2.f32 %v264_v49 }
  0x6e   : > { %611 = vlog2.f32 %v271_v52 }
  0x79   : > { %v610_v60 = vpop.eup %609 }
  0x7a   : > { %v273_v61 = vmul.f32 0.6931472, %v610_v60 }
  0x7b   : > { %v612_v63 = vpop.eup %611 }
  0x7c   : > { %v275_v0 = vmul.f32 0.6931472, %v612_v63  ;;  %v307_v2 = vsub.f32 %v299_v59, %v273_v61 }
  0x7e   : > { %v308_v3 = vsub.f32 %v306_v62, %v275_v0  ;;  %v309_v4 = vmul.f32 1.442695, %v307_v2 }
  0x80   : > { %613 = vpow2.f32 %v309_v4  ;;  %v311_v5 = vmul.f32 1.442695, %v308_v3 }
  0x82   : > { %615 = vpow2.f32 %v311_v5 }
  0x8d   : > { %v614_v6 = vpop.eup %613 }
  0x8e   : > { %v313_v7 = vsub.f32 1.0, %v614_v6 }
  0x8f   : > { %v616_v8 = vpop.eup %615 }
  0x90   : > { %v314_v9 = vsub.f32 1.0, %v616_v8  ;;  %v315_v10 = vmax.f32 %v313_v7, 0.0 }
  0x92   : > { %v316_v11 = vmax.f32 %v314_v9, 0.0  ;;  %617 = vrsqrt.f32 %v315_v10  ;;  %vm319_vm4 = vcmp.eq.f32.partialorder %v315_v10, inf  ;;  %v322_v13 = vand.u32 2147483648, %v315_v10 }
  0x93   : > { %vm321_vm5 = vcmp.eq.f32.partialorder %v315_v10, 0.0 }
  0x94   : > { %619 = vrsqrt.f32 %v316_v11  ;;  %vm326_vm6 = vcmp.eq.f32.partialorder %v316_v11, inf  ;;  %v329_v18 = vand.u32 2147483648, %v316_v11  ;;  %vm328_vm7 = vcmp.eq.f32.partialorder %v316_v11, 0.0 }
  0x9f   : > { %v618_v12 = vpop.eup %617 }
  0xa0   : > { %v318_v14 = vmul.f32 %v618_v12, %v315_v10 }
  0xa1   : > { %v620_v17 = vpop.eup %619 }
  0xa2   : > { %v320_v19 = vsel %vm319_vm4, %v315_v10, %v318_v14  ;;  %v325_v20 = vmul.f32 %v620_v17, %v316_v11 }
  0xa3   : > { %v323_v21 = vsel %vm321_vm5, %v322_v13, %v320_v19 }
  0xa4   : > { %v327_v24 = vsel %vm326_vm6, %v316_v11, %v325_v20  ;;  %v331_v26 = vsub.f32 0.0, %v323_v21 }
  0xa5   : > { %v330_v28 = vsel %vm328_vm7, %v329_v18, %v327_v24 }
  0xa6   : > { %v332_v29 = vsub.f32 0.0, %v330_v28  ;;  %v333_v30 = vmul.f32 %v331_v26, %v307_v2 }
  0xa8   : > { %v334_v31 = vmul.f32 %v332_v29, %v308_v3 }
  0xaa   : > { %v349_v33 = vcombine.low %v333_v30, %v334_v31 }
  0xac   : > { %v356_v34 = vrot.slane %v349_v33, %v355_v32 }
  0xae   : > { %v363_v36 = vrot.slane %v356_v34, %v355_v32 }
  0xb0   : > { %v365_v37 = vadd.f32 %v363_v36, %v342_v35 }
  0xb2   : > { %370 = vst.msk [vmem:[#allocation2] sm:$0x3] %vm907_vm0, %v365_v37 }
  0xb9   : > { %v374_v38 = vld [vmem:[#allocation2] sm:$0x3] }
  0xba   : > { %v379_v39 = vrot.slane %v374_v38, %v280_v23  ;;  %v383_v40 = vrot.slane %v374_v38, %v284_v25 }
  0xbc   : > { %v387_v41 = vsel %vm386_vm8, %v379_v39, 0.0  ;;  %v388_v42 = vsel %vm386_vm8, %v383_v40, 0.0 }
  0xbd   : > { %v389_v43 = vadd.f32 %v388_v42, %v387_v41 }
  0xbf   : > { %390 = vadd.xlane.f32.xlu0 %v389_v43 }
 0x148   : > { %v391_v44 = vpop.xlane.xlu0 %390 }
 0x149   : > { %v392_v45 = vrot.slane %v391_v44, 4 }
 0x14b   : > { %v393_v46 = vadd.f32 %v392_v45, %v391_v44 }
 0x14d   : > { %v394_v1 = vrot.slane %v393_v46, 2 }
 0x14f   : > { %v395_v47 = vadd.f32 %v394_v1, %v393_v46 }
 0x151   : > { %v396_v48 = vrot.slane %v395_v47, 1 }
 0x153   : > { %v397_v49 = vadd.f32 %v396_v48, %v395_v47 }
 0x155   : > { %535 = vpush %v397_v49 }
 0x186   : > { %s536_s28 = spop %535 }
 0x187   : > { %v399_v22 = vstv %s536_s28 }
 0x188   : > { %400 = vst [vmem:[%s216_s21] sm:$0x1] %v399_v22 }
 0x189   : > { %690 = shalt.err (!%p687_p6)
}
 0x18a   : > { %s691_s15 = scalar_lea.hbm %s412_s7, 16  ;;  %s695_s19 = scalar_lea.hbm %s985_s2, 32 }
 0x18b   : > { %p692_p7 = scmp.ne.s32.totalorder %s412_s7, %s691_s15  ;;  %p696_p4 = scmp.lt.s32.totalorder %s412_s7, %s985_s2 }
 0x18c   : > { %p697_p10 = scmp.lt.s32.totalorder %s695_s19, %s691_s15 }
 0x18d   : > { %p693_p1 = pnand %p692_p7, %p834_p9 }
 0x18e   : > { %p698_p8 = por %p697_p10, %p696_p4 }
 0x18f   : > { %p694_p2 = pneg %p693_p1 }
 0x191   : > { %p699_p0 = pnand %p698_p8, %p694_p2 }
 0x193   : > { %702 = shalt.err (!%p699_p0)
}
 0x194   : > { %541 = dma.vmem_to_hbm [thread:$0]  (%p834_p9), %s938_s26, 16, %s412_s7, %s402_s8  }
 0x195 PF: > { %s426_s20 = sand.u32 1, %s741_s9   ;;  %p994_p3 = scmp.ge.s32.totalorder %s761_s14, 2 }
 0x196   : > { %s427_s21 = scalar_lea.sflag [#allocation5], %s426_s20 }
 0x197   : > { %p551_p13 = pnand %p994_p3, %p841_p11 }
 0x199   : > { %p552_p5 = pneg %p551_p13 }
 0x19b   : > { %736 = dma.done.wait (%p552_p5), %s427_s21, 16  }
 0x19c   : > { %738 = vsyncadd (%p552_p5), %s427_s21, 4294967280  ;;  %s21_s14 = sadd.s32 1, %s761_s14   ;;  %s995_s9 = smov %s745_s10 }
 0x19d   : > { %p18_p12 = scmp.ge.s32.totalorder %s21_s14, 4   ;;  %s996_s10 = smov %s749_s11 }
 0x19e   : > { %s997_s11 = smov %s839_s23  ;;  %s998_s12 = smov %s757_s13 }
 0x19f   : > { %s999_s13 = smov %s1001_s17  ;;  %20 = sbr.rel (!%p18_p12) target bundleno = 8 (0x8), region = 94 }
 0x1a4   :  { %431 = vsyncpa [#allocation4], 1 }
 0x1a5   :  { %433 = vsyncpa [#allocation4 + $0x1], 1 }
 0x1a6   :  { %434 = vsyncpa [#allocation7], 1 }
 0x1a7   :  { %436 = vsyncpa [#allocation7 + $0x1], 1 }
 0x1a8   :  { %437 = vsyncpa [#allocation5], 1 }
 0x1a9   :  { %439 = vsyncpa [#allocation5 + $0x1], 1 }

</bundles_post_ra>
